<compile_context>
chip_gen: v7x
topology: tpu7x:2x2x1
jax: 0.10.0
libtpu: 0.0.40
codegen_flags: <defaults>
</compile_context>

<pallas_src>
import jax
import jax.numpy as jnp
from jax.experimental import pallas as pl
from jax.experimental.pallas import tpu as pltpu

_LANES = 128
_WIDE_LANES = 1024
_SUBLANES = 8
_MAX_TILE_ROWS = 512            # 512 x 1024 f32 = 2 MiB per stream block
_OUTER_SPLIT_MIN_ROWS = 128     # split the sum into 2 partials above this
_VMEM_LIMIT_BYTES = 48 << 20    # > v5e's 16 MiB default, <= v7x 64 MiB - headroom


def _round_up(x, m):
    return ((x + m - 1) // m) * m


def _cdiv(a, b):
    return -(-a // b)


def _concrete_float(x):
    """Return x as a Python float if it is concrete, else None (traced)."""
    if isinstance(x, (int, float)):
        return float(x)
    try:
        return float(x)
    except Exception:
        return None


# ----------------------------- kernels -------------------------------------


def _make_elem_kernel(weighted, scale):
    """Elementwise (pred - target)^2 [* weight] * scale (scale baked in)."""

    def kernel(*refs):
        if weighted:
            pred_ref, target_ref, weight_ref, out_ref = refs
        else:
            pred_ref, target_ref, out_ref = refs
        d = (pred_ref[...] - target_ref[...]).astype(jnp.float32)
        r = d * d
        if weighted:
            r = r * weight_ref[...].astype(jnp.float32)
        if scale != 1.0:
            r = r * jnp.float32(scale)
        out_ref[...] = r.astype(out_ref.dtype)

    return kernel


def _make_sum_kernel(weighted, scale_const):
    """Accumulate (pred-target)^2 [* weight]; one XLU reduce + scale in epilogue."""

    def kernel(*refs):
        if scale_const is None:
            scale_ref, *refs = refs
        if weighted:
            pred_ref, target_ref, weight_ref, out_ref, acc_ref = refs
        else:
            pred_ref, target_ref, out_ref, acc_ref = refs

        @pl.when(pl.program_id(1) == 0)
        def _():
            acc_ref[...] = jnp.zeros_like(acc_ref)

        d = (pred_ref[...] - target_ref[...]).astype(jnp.float32)
        contrib = d * d
        if weighted:
            contrib = contrib * weight_ref[...].astype(jnp.float32)
        acc_ref[...] += contrib  # pure VPU accumulation, no per-step XLU reduce

        @pl.when(pl.program_id(1) == pl.num_programs(1) - 1)
        def _():
            if scale_const is not None:
                s = jnp.float32(scale_const)
            else:
                s = scale_ref[0]
            total = jnp.sum(acc_ref[...]) * s
            out_ref[...] = jnp.full(out_ref.shape, total, out_ref.dtype)

    return kernel


# ----------------------------- planning ------------------------------------


def _plan_elem(n):
    """(lane, padded_rows, tile_rows, grid_n) for an n-element tensor."""
    lane = _WIDE_LANES if n >= _WIDE_LANES else _LANES
    rows_needed = max(1, _cdiv(n, lane))
    if rows_needed <= _MAX_TILE_ROWS:
        # single block spanning the full row extent -> zero row padding
        return lane, rows_needed, rows_needed, 1
    grid_n = _cdiv(rows_needed, _MAX_TILE_ROWS)
    tile_rows = _round_up(_cdiv(rows_needed, grid_n), _SUBLANES)
    rows = grid_n * tile_rows               # row padding <= 8*grid_n - 1
    return lane, rows, tile_rows, grid_n


def _plan_sum(n):
    """(lane, padded_rows, tile_rows, outer, inner); outer=2 -> megacore split."""
    lane = _WIDE_LANES if n >= _WIDE_LANES else _LANES
    rows_needed = max(1, _cdiv(n, lane))
    outer = 2 if rows_needed >= _OUTER_SPLIT_MIN_ROWS else 1
    rpo = _cdiv(rows_needed, outer)
    if outer == 1 and rpo <= _MAX_TILE_ROWS:
        return lane, rows_needed, rows_needed, 1, 1
    inner = _cdiv(rpo, _MAX_TILE_ROWS)
    tile_rows = _round_up(_cdiv(rpo, inner), _SUBLANES)
    rows = outer * inner * tile_rows
    return lane, rows, tile_rows, outer, inner


def _to_slab(x, rows, lane):
    """Flatten; zero-pad only if needed; reshape to [rows, lane]."""
    flat = x.reshape(-1)
    pad = rows * lane - flat.shape[0]
    if pad:
        flat = jnp.pad(flat, (0, pad))
    return flat.reshape(rows, lane)


# ----------------------------- wrappers ------------------------------------


def _elementwise_loss(pred, target, weight, loss_weight):
    n = pred.size
    lane, rows, tile_rows, grid_n = _plan_elem(n)
    weighted = weight is not None
    slabs = [_to_slab(pred, rows, lane), _to_slab(target, rows, lane)]
    if weighted:
        slabs.append(_to_slab(weight, rows, lane))

    blk = pl.BlockSpec((tile_rows, lane), lambda i: (i, 0))
    out = pl.pallas_call(
        _make_elem_kernel(weighted, float(loss_weight)),
        out_shape=jax.ShapeDtypeStruct((rows, lane), pred.dtype),
        grid_spec=pltpu.PrefetchScalarGridSpec(
            num_scalar_prefetch=0,
            grid=(grid_n,),
            in_specs=[blk] * len(slabs),
            out_specs=blk,
        ),
        compiler_params=pltpu.CompilerParams(
            dimension_semantics=("parallel",),
            vmem_limit_bytes=_VMEM_LIMIT_BYTES),
    )(*slabs)

    flat = out.reshape(-1)
    if flat.shape[0] != n:          # only when padding actually happened
        flat = flat[:n]
    return flat.reshape(pred.shape)


def _sum_loss(pred, target, weight, scale):
    """Returns scale * sum((pred - target)^2 [* weight]) as an f32 scalar."""
    n = pred.size
    lane, rows, tile_rows, outer, inner = _plan_sum(n)
    weighted = weight is not None
    slabs = [_to_slab(pred, rows, lane), _to_slab(target, rows, lane)]
    if weighted:
        # zero padding of weight guarantees padded elements contribute 0
        slabs.append(_to_slab(weight, rows, lane))

    scale_const = _concrete_float(scale)
    operands = list(slabs)
    in_specs = []
    if scale_const is None:
        # traced avg_factor: read scale once in the epilogue from SMEM
        operands = [jnp.asarray(scale, jnp.float32).reshape(1)] + operands
        in_specs.append(pl.BlockSpec(memory_space=pltpu.MemorySpace.SMEM))

    blk = pl.BlockSpec((tile_rows, lane), lambda c, i: (c * inner + i, 0))
    in_specs += [blk] * len(slabs)

    out = pl.pallas_call(
        _make_sum_kernel(weighted, scale_const),
        out_shape=jax.ShapeDtypeStruct((outer, _SUBLANES, _LANES), jnp.float32),
        grid_spec=pltpu.PrefetchScalarGridSpec(
            num_scalar_prefetch=0,
            grid=(outer, inner),
            in_specs=in_specs,
            out_specs=pl.BlockSpec((1, _SUBLANES, _LANES),
                                   lambda c, i: (c, 0, 0)),
            scratch_shapes=[pltpu.VMEM((tile_rows, lane), jnp.float32)],
        ),
        compiler_params=pltpu.CompilerParams(
            dimension_semantics=("parallel", "arbitrary"),
            vmem_limit_bytes=_VMEM_LIMIT_BYTES),
    )(*operands)

    # each outer partial is already scaled; sum the (outer) partials
    return out[:, 0, 0].sum()


class MSELoss:
    """JAX/Pallas port of rfvision MSELoss (weighted_loss-wrapped F.mse_loss)."""

    def __init__(self, reduction="mean", loss_weight=1.0):
        assert reduction in ("none", "mean", "sum")
        self.reduction = reduction
        self.loss_weight = float(loss_weight)

    def __call__(self, pred, target, weight=None, avg_factor=None):
        pred = jnp.asarray(pred)
        target = jnp.asarray(target)
        w = None
        if weight is not None:
            w = jnp.asarray(weight)
            if w.shape != pred.shape:
                # TODO(synk): for genuinely smaller weights, broadcast inside
                # the kernel (constant index_map / stride-0 sublane) instead of
                # materializing a full-size HBM slab here.
                w = jnp.broadcast_to(w, pred.shape)

        if self.reduction == "none":
            # mmdet weight_reduce_loss ignores avg_factor for reduction='none'
            return _elementwise_loss(pred, target, w, self.loss_weight)

        if self.reduction == "sum":
            if avg_factor is not None:
                raise ValueError(
                    'avg_factor can not be used with reduction="sum"')
            divisor = 1.0
        else:  # mean
            divisor = float(pred.size) if avg_factor is None else avg_factor

        divisor_const = _concrete_float(divisor)
        if divisor_const is not None:
            scale = self.loss_weight / divisor_const          # Python float -> baked
        else:
            scale = (jnp.asarray(self.loss_weight, jnp.float32)
                     / jnp.asarray(divisor, jnp.float32))     # traced -> SMEM
        return _sum_loss(pred, target, w, scale).astype(pred.dtype)


# ------------------------------- demo ---------------------------------------

if __name__ == "__main__":
    key = jax.random.PRNGKey(0)
    k1, k2, k3, k4, k5, k6, k7 = jax.random.split(key, 7)
    shape = (2, 4, 16, 16)  # NCHW-like prediction/target
    pred = jax.random.normal(k1, shape, dtype=jnp.float32)
    target = jax.random.normal(k2, shape, dtype=jnp.float32)
    weight = jax.random.uniform(k3, shape, dtype=jnp.float32)

    loss_fn = MSELoss(reduction="mean", loss_weight=1.0)

    loss_mean = jax.block_until_ready(loss_fn(pred, target))
    loss_mean_w = jax.block_until_ready(loss_fn(pred, target, weight=weight))
    loss_avg = jax.block_until_ready(
        loss_fn(pred, target, weight=weight, avg_factor=100.0))
    loss_none_w = jax.block_until_ready(
        MSELoss(reduction="none")(pred, target, weight=weight))
    loss_none = jax.block_until_ready(MSELoss(reduction="none")(pred, target))
    loss_sum = jax.block_until_ready(
        MSELoss(reduction="sum", loss_weight=0.5)(pred, target))

    # ragged (non block-aligned) shape exercises the tiny-padding path
    rshape = (3, 5, 7)
    pred_r = jax.random.normal(k4, rshape, dtype=jnp.float32)
    target_r = jax.random.normal(k5, rshape, dtype=jnp.float32)
    loss_ragged = jax.block_until_ready(loss_fn(pred_r, target_r))

    # medium shape exercises the 2-partial outer split of the sum path
    mshape = (2, 4, 128, 128)
    pred_m = jax.random.normal(k6, mshape, dtype=jnp.float32)
    target_m = jax.random.normal(k7, mshape, dtype=jnp.float32)
    loss_mean_m = jax.block_until_ready(loss_fn(pred_m, target_m))

    # traced avg_factor exercises the SMEM-scale fallback path
    jit_loss = jax.jit(
        lambda p, t, w, af: MSELoss()(p, t, weight=w, avg_factor=af))
    loss_avg_traced = jax.block_until_ready(
        jit_loss(pred, target, weight, jnp.float32(100.0)))

    # reference checks in plain JAX
    ref_elem = (pred - target) ** 2
    assert jnp.allclose(loss_mean, ref_elem.mean(), rtol=1e-5, atol=1e-5)
    assert jnp.allclose(loss_mean_w, (ref_elem * weight).mean(),
                        rtol=1e-5, atol=1e-5)
    assert jnp.allclose(loss_avg, (ref_elem * weight).sum() / 100.0,
                        rtol=1e-5, atol=1e-5)
    assert jnp.allclose(loss_avg_traced, (ref_elem * weight).sum() / 100.0,
                        rtol=1e-5, atol=1e-5)
    assert jnp.allclose(loss_none_w, ref_elem * weight, rtol=1e-5, atol=1e-5)
    assert jnp.allclose(loss_none, ref_elem, rtol=1e-5, atol=1e-5)
    assert jnp.allclose(loss_sum, 0.5 * ref_elem.sum(), rtol=1e-5, atol=1e-4)
    assert jnp.allclose(loss_ragged, ((pred_r - target_r) ** 2).mean(),
                        rtol=1e-5, atol=1e-5)
    assert jnp.allclose(loss_mean_m, ((pred_m - target_m) ** 2).mean(),
                        rtol=1e-5, atol=1e-5)

    print("KERNEL_OK")
</pallas_src>

<mosaic_0001>
module attributes {stable_mosaic.version = 11 : i64} {
  func.func @kernel(%arg0: i32, %arg1: i32, %arg2: memref<2x1024xf32, #tpu.memory_space<vmem>>, %arg3: memref<2x1024xf32, #tpu.memory_space<vmem>>, %arg4: memref<1x8x128xf32, #tpu.memory_space<vmem>>, %arg5: memref<2x1024xf32, #tpu.memory_space<vmem>>) attributes {dimension_semantics = [#tpu.dimension_semantics<parallel>, #tpu.dimension_semantics<arbitrary>], iteration_bounds = array<i64: 1, 1>, scalar_prefetch = 0 : i64, scratch_operands = 1 : i64, tpu.core_type = #tpu.core_type<tc>, window_params = [{transform_indices = @transform_0, window_bounds = array<i64: 2, 1024>}, {transform_indices = @transform_1, window_bounds = array<i64: 2, 1024>}, {transform_indices = @transform_2, window_bounds = array<i64: 1, 8, 128>}]} {
    %c0_i32 = arith.constant 0 : i32
    %0 = arith.cmpi eq, %arg1, %c0_i32 : i32
    %1 = arith.extui %0 : i1 to i32
    %c0_i32_0 = arith.constant 0 : i32
    %2 = arith.cmpi ne, %1, %c0_i32_0 : i32
    scf.if %2 {
      %cst = arith.constant 0.000000e+00 : f32
      %13 = vector.broadcast %cst : f32 to vector<2x1024xf32>
      %c0_10 = arith.constant 0 : index
      %c0_11 = arith.constant 0 : index
      %14 = vector.load %arg5[%c0_10, %c0_11] : memref<2x1024xf32, #tpu.memory_space<vmem>>, vector<2x1024xf32>
      tpu.vector_store %arg5[%c0_10, %c0_11], %13 {strides = array<i32>} : memref<2x1024xf32, #tpu.memory_space<vmem>>, vector<2x1024xf32>,
    } else {
    }
    %c0 = arith.constant 0 : index
    %c0_1 = arith.constant 0 : index
    %3 = vector.load %arg2[%c0, %c0_1] : memref<2x1024xf32, #tpu.memory_space<vmem>>, vector<2x1024xf32>
    %c0_2 = arith.constant 0 : index
    %c0_3 = arith.constant 0 : index
    %4 = vector.load %arg3[%c0_2, %c0_3] : memref<2x1024xf32, #tpu.memory_space<vmem>>, vector<2x1024xf32>
    %5 = arith.subf %3, %4 : vector<2x1024xf32>
    %6 = arith.mulf %5, %5 : vector<2x1024xf32>
    %c0_4 = arith.constant 0 : index
    %c0_5 = arith.constant 0 : index
    %7 = vector.load %arg5[%c0_4, %c0_5] : memref<2x1024xf32, #tpu.memory_space<vmem>>, vector<2x1024xf32>
    %8 = arith.addf %7, %6 : vector<2x1024xf32>
    %c0_6 = arith.constant 0 : index
    %c0_7 = arith.constant 0 : index
    %9 = vector.load %arg5[%c0_6, %c0_7] : memref<2x1024xf32, #tpu.memory_space<vmem>>, vector<2x1024xf32>
    tpu.vector_store %arg5[%c0_6, %c0_7], %8 {strides = array<i32>} : memref<2x1024xf32, #tpu.memory_space<vmem>>, vector<2x1024xf32>,
    %c0_i32_8 = arith.constant 0 : i32
    %10 = arith.cmpi eq, %arg1, %c0_i32_8 : i32
    %11 = arith.extui %10 : i1 to i32
    %c0_i32_9 = arith.constant 0 : i32
    %12 = arith.cmpi ne, %11, %c0_i32_9 : i32
    scf.if %12 {
      %c0_10 = arith.constant 0 : index
      %c0_11 = arith.constant 0 : index
      %13 = vector.load %arg5[%c0_10, %c0_11] : memref<2x1024xf32, #tpu.memory_space<vmem>>, vector<2x1024xf32>
      %14 = vector.shape_cast %13 : vector<2x1024xf32> to vector<1x2x1024xf32>
      %cst = arith.constant dense<0.000000e+00> : vector<1xf32>
      %15 = vector.multi_reduction <add>, %14, %cst [1, 2] : vector<1x2x1024xf32> to vector<1xf32>
      %16 = vector.shape_cast %15 : vector<1xf32> to vector<1x1x1xf32>
      %17 = vector.extract %16[0, 0, 0] : f32 from vector<1x1x1xf32>
      %cst_12 = arith.constant 4.8828125E-4 : f32
      %18 = arith.mulf %17, %cst_12 : f32
      %19 = vector.broadcast %18 : f32 to vector<1x8x128xf32>
      %c0_13 = arith.constant 0 : index
      %c0_14 = arith.constant 0 : index
      %c0_15 = arith.constant 0 : index
      %20 = vector.load %arg4[%c0_13, %c0_14, %c0_15] : memref<1x8x128xf32, #tpu.memory_space<vmem>>, vector<1x8x128xf32>
      tpu.vector_store %arg4[%c0_13, %c0_14, %c0_15], %19 {strides = array<i32>} : memref<1x8x128xf32, #tpu.memory_space<vmem>>, vector<1x8x128xf32>,
    } else {
    }
    return
  }
  func.func @transform_0(%arg0: i32, %arg1: i32) -> (i32, i32) {
    %c1_i32 = arith.constant 1 : i32
    %0 = arith.muli %arg0, %c1_i32 : i32
    %1 = arith.addi %0, %arg1 : i32
    %c0_i32 = arith.constant 0 : i32
    %c0_i32_0 = arith.constant 0 : i32
    return %1, %c0_i32 : i32, i32
  }
  func.func @transform_1(%arg0: i32, %arg1: i32) -> (i32, i32) {
    %c1_i32 = arith.constant 1 : i32
    %0 = arith.muli %arg0, %c1_i32 : i32
    %1 = arith.addi %0, %arg1 : i32
    %c0_i32 = arith.constant 0 : i32
    %c0_i32_0 = arith.constant 0 : i32
    return %1, %c0_i32 : i32, i32
  }
  func.func @transform_2(%arg0: i32, %arg1: i32) -> (i32, i32, i32) {
    %c0_i32 = arith.constant 0 : i32
    %c0_i32_0 = arith.constant 0 : i32
    %c0_i32_1 = arith.constant 0 : i32
    return %arg0, %c0_i32, %c0_i32_0 : i32, i32, i32
  }
}

</mosaic_0001>

<bundles_post_ra>
// kernel: tpu_custom_call.1
= control target key start
LH: loop header
LB: loop body
LE: loop exit
PB: predicated region body
PF: predicated region fallthrough
CT: control target
= control target key end

     0   :  { %7 = vsyncpa [#allocation4], 0  ;;  %s300_s0 = inlined_call_operand.hbm [shape: f32[2,1024], index: 0, kind: input, shape index: {}]   ;;  %s301_s1 = inlined_call_operand.hbm [shape: f32[2,1024], index: 1, kind: input, shape index: {}]   ;;  %s302_s2 = inlined_call_operand.hbm [shape: f32[1,8,128], index: 2, kind: output, shape index: {}]  }
   0x1   :  { %8 = vsyncpa [#allocation7], 0 }
   0x2   :  { %9 = vsyncpa [#allocation5], 0  ;;  %s237_s9 = smov [#allocation3]   ;;  %s238_s11 = smov [#allocation6]  }
   0x3   :  { %s20_s10 = sshll.u32 %s237_s9, 4  ;;  %s34_s12 = sshll.u32 %s238_s11, 4  ;;  %s21_s10 = int_to_ptr.vmem [resolvable:$true] %s20_s10  ;;  %s35_s12 = int_to_ptr.vmem [resolvable:$true] %s34_s12 }
   0x4   :  { %s165_s15 = scalar_lea.hbm %s300_s0, 256 }
   0x5   :  { %p166_p0 = scmp.ne.s32.totalorder %s300_s0, %s165_s15  ;;  %p169_p1 = scmp.lt.u32.totalorder %s165_s15, %s300_s0 }
   0x7   :  { %p171_p2 = pnand %p169_p1, %p166_p0 }
   0x9   :  { %174 = shalt.err (!%p171_p2)
}
   0xa   :  { %s175_s20 = scalar_lea.vmem %s21_s10, 256  ;;  %p180_p4 = scmp.lt.s32.totalorder %s21_s10, %s21_s10 }
   0xb   :  { %p176_p3 = scmp.ne.s32.totalorder %s21_s10, %s175_s20  ;;  %p181_p5 = scmp.lt.s32.totalorder %s175_s20, %s175_s20 }
   0xd   :  { %p182_p6 = por %p181_p5, %p180_p4 }
   0xf   :  { %p183_p7 = pnand %p182_p6, %p176_p3 }
  0x11   :  { %186 = shalt.err (!%p183_p7)
}
  0x12   :  { %23 = dma.hbm_to_vmem [thread:$0]  %s300_s0, 256, %s21_s10, [#allocation4]  }
  0x13   :  { %s187_s25 = scalar_lea.hbm %s301_s1, 256 }
  0x14   :  { %p188_p8 = scmp.ne.s32.totalorder %s301_s1, %s187_s25  ;;  %p191_p9 = scmp.lt.u32.totalorder %s187_s25, %s301_s1 }
  0x16   :  { %p193_p10 = pnand %p191_p9, %p188_p8 }
  0x18   :  { %196 = shalt.err (!%p193_p10)
}
  0x19   :  { %s197_s30 = scalar_lea.vmem %s35_s12, 256  ;;  %p202_p12 = scmp.lt.s32.totalorder %s35_s12, %s35_s12 }
  0x1a   :  { %p198_p11 = scmp.ne.s32.totalorder %s35_s12, %s197_s30  ;;  %p203_p13 = scmp.lt.s32.totalorder %s197_s30, %s197_s30 }
  0x1c   :  { %p204_p0 = por %p203_p13, %p202_p12 }
  0x1e   :  { %p205_p1 = pnand %p204_p0, %p198_p11 }
  0x20   :  { %208 = shalt.err (!%p205_p1)
}
  0x21   :  { %37 = dma.hbm_to_vmem [thread:$0]  %s301_s1, 256, %s35_s12, [#allocation7]  }
  0x22   :  { %231 = dma.done.wait [#allocation4], 256  }
  0x23   :  { %232 = vsyncadd [#allocation4], 4294967040 }
  0x24   :  { %233 = dma.done.wait [#allocation7], 256  }
  0x25   :  { %234 = vsyncadd [#allocation7], 4294967040  ;;  %v77_v0 = vlaneseq  ;;  %v239_v1 = vmov 1983009808   ;;  %v52_v5 = vld [vmem:[#allocation3] sm:$0xff]  ;;  %v53_v6 = vld [vmem:[#allocation3 + $0x8] sm:$0xff] }
  0x26   :  { %v75_v2 = vunpack.c.l.s4 %v239_v1  ;;  %v54_v7 = vld [vmem:[#allocation6] sm:$0xff]  ;;  %v55_v8 = vld [vmem:[#allocation6 + $0x8] sm:$0xff]  ;;  %vm115_vm0 = vcmask 1041408   ;;  %s240_s1 = smov [#allocation8]  }
  0x27   :  { %v78_v4 = vshrl.u32 %v77_v0, 7  ;;  %v56_v9 = vsub.f32 %v52_v5, %v54_v7  ;;  %v57_v11 = vsub.f32 %v53_v6, %v55_v8  ;;  %s149_s4 = sshll.u32 %s240_s1, 4  ;;  %s150_s4 = int_to_ptr.vmem [resolvable:$true] %s149_s4 }
  0x28   :  { %v76_v3 = vunpack.c.0.s8 %v75_v2  ;;  %s209_s7 = scalar_lea.vmem %s150_s4, 128  ;;  %p214_p3 = scmp.lt.s32.totalorder %s150_s4, %s150_s4 }
  0x29   :  { %v58_v12 = vmul.f32 %v56_v9, %v56_v9  ;;  %v59_v13 = vmul.f32 %v57_v11, %v57_v11  ;;  %p210_p2 = scmp.ne.s32.totalorder %s150_s4, %s209_s7  ;;  %p215_p4 = scmp.lt.s32.totalorder %s209_s7, %s209_s7 }
  0x2a   :  { %v79_v10 = vsub.s32 %v76_v3, %v78_v4 }
  0x2b   :  { %v73_v14 = vcombine.high %v58_v12, %v58_v12  ;;  %v90_v16 = vcombine.high %v59_v13, %v59_v13  ;;  %p216_p5 = por %p215_p4, %p214_p3 }
  0x2c   :  { %v80_v15 = vrot.slane %v58_v12, %v79_v10  ;;  %v97_v19 = vrot.slane %v59_v13, %v79_v10 }
  0x2d   :  { %v87_v17 = vrot.slane %v73_v14, %v79_v10  ;;  %v104_v25 = vrot.slane %v90_v16, %v79_v10  ;;  %p217_p6 = pnand %p216_p5, %p210_p2 }
  0x2e   :  { %v88_v18 = vcombine.high %v80_v15, %v80_v15  ;;  %v116_v20 = vsel %vm115_vm0, %v80_v15, 0.0  ;;  %v105_v26 = vcombine.high %v97_v19, %v97_v19  ;;  %v123_v29 = vsel %vm115_vm0, %v97_v19, 0.0 }
  0x2f   :  { %v89_v21 = vcombine.high %v87_v17, %v87_v17  ;;  %v119_v23 = vsel %vm115_vm0, %v87_v17, 0.0  ;;  %v106_v31 = vcombine.high %v104_v25, %v104_v25  ;;  %v127_v34 = vsel %vm115_vm0, %v104_v25, 0.0 }
  0x30   :  { %v117_v22 = vsel %vm115_vm0, %v88_v18, 0.0  ;;  %v125_v32 = vsel %vm115_vm0, %v105_v26, 0.0 }
  0x31   :  { %v118_v24 = vadd.f32 %v117_v22, %v116_v20  ;;  %v121_v27 = vsel %vm115_vm0, %v89_v21, 0.0  ;;  %v129_v36 = vsel %vm115_vm0, %v106_v31, 0.0 }
  0x33   :  { %v120_v28 = vadd.f32 %v119_v23, %v118_v24 }
  0x35   :  { %v122_v30 = vadd.f32 %v121_v27, %v120_v28 }
  0x37   :  { %v124_v33 = vadd.f32 %v123_v29, %v122_v30 }
  0x39   :  { %v126_v35 = vadd.f32 %v125_v32, %v124_v33 }
  0x3b   :  { %v128_v37 = vadd.f32 %v127_v34, %v126_v35 }
  0x3d   :  { %v130_v38 = vadd.f32 %v129_v36, %v128_v37 }
  0x3f   :  { %131 = vadd.xlane.f32.xlu0 %v130_v38 }
  0xcc   :  { %v132_v39 = vpop.xlane.xlu0 %131 }
  0xcd   :  { %v133_v40 = vrot.slane %v132_v39, 4 }
  0xcf   :  { %v134_v41 = vadd.f32 %v133_v40, %v132_v39 }
  0xd1   :  { %v135_v42 = vrot.slane %v134_v41, 2 }
  0xd3   :  { %v136_v43 = vadd.f32 %v135_v42, %v134_v41 }
  0xd5   :  { %v137_v44 = vrot.slane %v136_v43, 1 }
  0xd7   :  { %v138_v45 = vadd.f32 %v137_v44, %v136_v43 }
  0xd9   :  { %159 = vpush %v138_v45 }
 0x10a   :  { %s160_s5 = spop %159 }
 0x10b   :  { %s140_s6 = smul.f32 0.00048828125, %s160_s5 }
 0x10d   :  { %v141_v46 = vstv %s140_s6 }
 0x10e   :  { %142 = vst [vmem:[#allocation8] sm:$0xff] %v141_v46 }
 0x10f   :  { %220 = shalt.err (!%p217_p6)
}
 0x110   :  { %s221_s10 = scalar_lea.hbm %s302_s2, 128 }
 0x111   :  { %p222_p7 = scmp.ne.s32.totalorder %s302_s2, %s221_s10  ;;  %p225_p8 = scmp.lt.u32.totalorder %s221_s10, %s302_s2 }
 0x113   :  { %p227_p9 = pnand %p225_p8, %p222_p7 }
 0x115   :  { %230 = shalt.err (!%p227_p9)
}
 0x116   :  { %152 = dma.vmem_to_hbm [thread:$0]  %s150_s4, 128, %s302_s2, [#allocation5]  }
 0x117   :  { %235 = dma.done.wait [#allocation5], 128  }
 0x118   :  { %236 = vsyncadd [#allocation5], 4294967168 }
 0x119   :  { %156 = vsyncpa [#allocation4], 1 }
 0x11a   :  { %157 = vsyncpa [#allocation7], 1 }
 0x11b   :  { %158 = vsyncpa [#allocation5], 1 }

</bundles_post_ra>
